<compile_context>
chip_gen: v7x
topology: tpu7x:2x2x1
jax: 0.10.0
libtpu: 0.0.40
codegen_flags: <defaults>
</compile_context>

<pallas_src>
import functools

import jax
import jax.numpy as jnp
from jax.experimental import pallas as pl
from jax.experimental.pallas import tpu as pltpu


def _dnnnet_kernel(x1_ref, x2_ref, w1_ref, w2_ref, b_ref, o_ref):
    # x1_ref: (tb, D1)  x2_ref: (tb, D2)  w1_ref: (D1, C)  w2_ref: (D2, C)
    # b_ref:  (1, C)    o_ref:  (tb, C)
    # cat([x1, x2], 1) @ W.T  ==  x1 @ W1 + x2 @ W2   (weight split row-wise)
    acc = jnp.dot(x1_ref[...], w1_ref[...], preferred_element_type=jnp.float32)
    acc = acc + jnp.dot(x2_ref[...], w2_ref[...],
                        preferred_element_type=jnp.float32)
    o_ref[...] = (acc + b_ref[...].astype(jnp.float32)).astype(o_ref.dtype)


def _round_up(x, m):
    return ((x + m - 1) // m) * m


@functools.partial(jax.jit, static_argnames=("block_b", "min_pallas_batch"))
def dnnnet_forward(data1, data2, w, b, *, block_b=1024, min_pallas_batch=256):
    """DNNNet.forward.

    data1: [B, N1, F1], data2: [B, N2, F2]
    w:     [n_classes, 106]  (torch nn.Linear weight layout)
    b:     [n_classes]
    returns [B, n_classes]
    """
    B = data1.shape[0]
    x1 = data1.reshape(B, -1)                 # flow1 = data1.view(B, -1)
    x2 = data2.reshape(B, -1)                 # flow2 = data2.view(B, -1)
    D1, D2 = x1.shape[1], x2.shape[1]
    C = w.shape[0]
    assert w.shape[1] == D1 + D2, "mlp3 in_features must equal D1 + D2"

    # Keep the input dtype (bf16 stays bf16 -> halves HBM reads on v6e/v7x);
    # accumulation is always f32 via preferred_element_type in the kernel.
    compute_dtype = jnp.promote_types(x1.dtype, w.dtype)
    x1 = x1.astype(compute_dtype)
    x2 = x2.astype(compute_dtype)

    # Pre-transpose + split the weight so the kernel never transposes/concats.
    # (All of this lives inside the single jit; no extra per-call dispatches.)
    w_t = w.T.astype(compute_dtype)           # [D1+D2, C]
    w1_t, w2_t = w_t[:D1], w_t[D1:]
    b2 = b.reshape(1, C)

    # Tiny batches: pure-XLA GEMV; pallas_call overhead would dominate.
    if B <= min_pallas_batch:
        return (x1 @ w1_t + x2 @ w2_t + b2).astype(compute_dtype)

    # Batch tile: big tiles amortize the ~0.35 us/grid-step overhead; when the
    # whole batch fits in one block, split it so the grid has >= 2 steps and
    # both v7x TensorCores get work (neutral on v5e/v6e).
    if B <= block_b:
        tb = _round_up(pl.cdiv(B, 2), 8) if B >= 16 else B
    else:
        tb = block_b
    grid = (pl.cdiv(B, tb),)                  # ragged last block is fine:
                                              # OOB reads are ignored garbage,
                                              # OOB writes are discarded.

    out = pl.pallas_call(
        _dnnnet_kernel,
        out_shape=jax.ShapeDtypeStruct((B, C), compute_dtype),
        grid=grid,
        in_specs=[
            pl.BlockSpec((tb, D1), lambda i: (i, 0)),   # x1 batch tile
            pl.BlockSpec((tb, D2), lambda i: (i, 0)),   # x2 batch tile
            pl.BlockSpec((D1, C), lambda i: (0, 0)),    # W1 (VMEM-resident)
            pl.BlockSpec((D2, C), lambda i: (0, 0)),    # W2 (VMEM-resident)
            pl.BlockSpec((1, C), lambda i: (0, 0)),     # bias (VMEM-resident)
        ],
        out_specs=pl.BlockSpec((tb, C), lambda i: (i, 0)),
        compiler_params=pltpu.CompilerParams(
            dimension_semantics=("parallel",)),
    )(x1, x2, w1_t, w2_t, b2)
    return out


def _reference_forward(data1, data2, w, b):
    """Pure-JAX reference (mirrors the PyTorch forward exactly)."""
    B = data1.shape[0]
    flow = jnp.concatenate(
        [data1.reshape(B, -1), data2.reshape(B, -1)], axis=1)
    return flow @ w.T + b


if __name__ == "__main__":
    # Shapes consistent with the module: flattened(data1) + flattened(data2)
    # must equal 106 (mlp3 = nn.Linear(106, n_classes)); n_classes = 9.
    n_classes = 9
    key = jax.random.PRNGKey(0)
    k1, k2, kw, kb = jax.random.split(key, 4)
    w = jax.random.normal(kw, (n_classes, 106), dtype=jnp.float32) * 0.1
    b = jax.random.normal(kb, (n_classes,), dtype=jnp.float32) * 0.1

    # --- Test 1: spec's tiny batch, force the Pallas path (single block). ---
    B = 2
    data1 = jax.random.normal(k1, (B, 8, 12), dtype=jnp.float32)   # -> 96
    data2 = jax.random.normal(k2, (B, 1, 10), dtype=jnp.float32)   # -> 10
    out = dnnnet_forward(data1, data2, w, b, min_pallas_batch=0)
    out = jax.block_until_ready(out)
    ref = _reference_forward(data1, data2, w, b)
    assert out.shape == (B, n_classes)
    assert jnp.allclose(out, ref, rtol=1e-4, atol=1e-4), "mismatch (B=2)"

    # --- Test 2: multi-block grid + ragged last tile (no host-side padding). ---
    B2 = 300
    d1b = jax.random.normal(k1, (B2, 8, 12), dtype=jnp.float32)
    d2b = jax.random.normal(k2, (B2, 1, 10), dtype=jnp.float32)
    out2 = dnnnet_forward(d1b, d2b, w, b, min_pallas_batch=0)
    out2 = jax.block_until_ready(out2)
    ref2 = _reference_forward(d1b, d2b, w, b)
    assert out2.shape == (B2, n_classes)
    assert jnp.allclose(out2, ref2, rtol=1e-4, atol=1e-4), "mismatch (B=300)"

    print("KERNEL_OK")
</pallas_src>

<mosaic_0001>
module attributes {stable_mosaic.version = 11 : i64} {
  func.func @_dnnnet_kernel(%arg0: i32, %arg1: memref<2x96xf32, #tpu.memory_space<vmem>>, %arg2: memref<2x10xf32, #tpu.memory_space<vmem>>, %arg3: memref<96x9xf32, #tpu.memory_space<vmem>>, %arg4: memref<10x9xf32, #tpu.memory_space<vmem>>, %arg5: memref<1x9xf32, #tpu.memory_space<vmem>>, %arg6: memref<2x9xf32, #tpu.memory_space<vmem>>) attributes {dimension_semantics = [#tpu.dimension_semantics<parallel>], iteration_bounds = array<i64: 1>, scalar_prefetch = 0 : i64, scratch_operands = 0 : i64, tpu.core_type = #tpu.core_type<tc>, window_params = [{transform_indices = @transform_0, window_bounds = array<i64: 2, 96>}, {transform_indices = @transform_1, window_bounds = array<i64: 2, 10>}, {pipeline_mode = #tpu.pipeline_mode<synchronous>, transform_indices = @transform_2, window_bounds = array<i64: 96, 9>}, {pipeline_mode = #tpu.pipeline_mode<synchronous>, transform_indices = @transform_3, window_bounds = array<i64: 10, 9>}, {pipeline_mode = #tpu.pipeline_mode<synchronous>, transform_indices = @transform_4, window_bounds = array<i64: 1, 9>}, {transform_indices = @transform_5, window_bounds = array<i64: 2, 9>}]} {
    %c0 = arith.constant 0 : index
    %c0_0 = arith.constant 0 : index
    %0 = vector.load %arg1[%c0, %c0_0] : memref<2x96xf32, #tpu.memory_space<vmem>>, vector<2x96xf32>
    %c0_1 = arith.constant 0 : index
    %c0_2 = arith.constant 0 : index
    %1 = vector.load %arg3[%c0_1, %c0_2] : memref<96x9xf32, #tpu.memory_space<vmem>>, vector<96x9xf32>
    %cst = arith.constant dense<0.000000e+00> : vector<2x9xf32>
    %2 = tpu.matmul %0, %1, %cst {dimension_numbers = #tpu.dot_dimension_numbers<[1], [0], [0], [1], [0, 0, 1, 1], [], []>} : vector<2x96xf32>, vector<96x9xf32>, vector<2x9xf32> -> vector<2x9xf32>
    %c0_3 = arith.constant 0 : index
    %c0_4 = arith.constant 0 : index
    %3 = vector.load %arg2[%c0_3, %c0_4] : memref<2x10xf32, #tpu.memory_space<vmem>>, vector<2x10xf32>
    %c0_5 = arith.constant 0 : index
    %c0_6 = arith.constant 0 : index
    %4 = vector.load %arg4[%c0_5, %c0_6] : memref<10x9xf32, #tpu.memory_space<vmem>>, vector<10x9xf32>
    %cst_7 = arith.constant dense<0.000000e+00> : vector<2x9xf32>
    %5 = tpu.matmul %3, %4, %cst_7 {dimension_numbers = #tpu.dot_dimension_numbers<[1], [0], [0], [1], [0, 0, 1, 1], [], []>} : vector<2x10xf32>, vector<10x9xf32>, vector<2x9xf32> -> vector<2x9xf32>
    %6 = arith.addf %2, %5 : vector<2x9xf32>
    %c0_8 = arith.constant 0 : index
    %c0_9 = arith.constant 0 : index
    %7 = vector.load %arg5[%c0_8, %c0_9] : memref<1x9xf32, #tpu.memory_space<vmem>>, vector<1x9xf32>
    %8 = vector.broadcast %7 : vector<1x9xf32> to vector<2x9xf32>
    %9 = arith.addf %6, %8 : vector<2x9xf32>
    %c0_10 = arith.constant 0 : index
    %c0_11 = arith.constant 0 : index
    %10 = vector.load %arg6[%c0_10, %c0_11] : memref<2x9xf32, #tpu.memory_space<vmem>>, vector<2x9xf32>
    tpu.vector_store %arg6[%c0_10, %c0_11], %9 {strides = array<i32>} : memref<2x9xf32, #tpu.memory_space<vmem>>, vector<2x9xf32>,
    return
  }
  func.func @transform_0(%arg0: i32) -> (i32, i32) {
    %c0_i32 = arith.constant 0 : i32
    %c0_i32_0 = arith.constant 0 : i32
    return %arg0, %c0_i32 : i32, i32
  }
  func.func @transform_1(%arg0: i32) -> (i32, i32) {
    %c0_i32 = arith.constant 0 : i32
    %c0_i32_0 = arith.constant 0 : i32
    return %arg0, %c0_i32 : i32, i32
  }
  func.func @transform_2(%arg0: i32) -> (i32, i32) {
    %c0_i32 = arith.constant 0 : i32
    %c0_i32_0 = arith.constant 0 : i32
    %c0_i32_1 = arith.constant 0 : i32
    return %c0_i32, %c0_i32_0 : i32, i32
  }
  func.func @transform_3(%arg0: i32) -> (i32, i32) {
    %c0_i32 = arith.constant 0 : i32
    %c0_i32_0 = arith.constant 0 : i32
    %c0_i32_1 = arith.constant 0 : i32
    return %c0_i32, %c0_i32_0 : i32, i32
  }
  func.func @transform_4(%arg0: i32) -> (i32, i32) {
    %c0_i32 = arith.constant 0 : i32
    %c0_i32_0 = arith.constant 0 : i32
    %c0_i32_1 = arith.constant 0 : i32
    return %c0_i32, %c0_i32_0 : i32, i32
  }
  func.func @transform_5(%arg0: i32) -> (i32, i32) {
    %c0_i32 = arith.constant 0 : i32
    %c0_i32_0 = arith.constant 0 : i32
    return %arg0, %c0_i32 : i32, i32
  }
}

</mosaic_0001>

<bundles_post_ra>
// kernel: dnnnet_forward.1
= control target key start
LH: loop header
LB: loop body
LE: loop exit
PB: predicated region body
PF: predicated region fallthrough
CT: control target
= control target key end

     0   :  { %vm41_vm0 = vcmask 1041408   ;;  %v318_v3 = vmov 0.0|0.0   ;;  %vm319_vm1 = vmmov 0   ;;  %v320_v6 = vmov 0.0   ;;  %s417_s0 = inlined_call_operand.vmem [shape: f32[2,96], index: 0, kind: input, shape index: {}]   ;;  %s418_s1 = inlined_call_operand.vmem [shape: f32[2,10], index: 1, kind: input, shape index: {}]   ;;  %s419_s2 = inlined_call_operand.vmem [shape: f32[96,9], index: 2, kind: input, shape index: {}]   ;;  %s420_s3 = inlined_call_operand.vmem [shape: f32[10,9], index: 3, kind: input, shape index: {}]   ;;  %s421_s4 = inlined_call_operand.vmem [shape: f32[1,9], index: 4, kind: input, shape index: {}]   ;;  %s422_s5 = inlined_call_operand.hbm [shape: f32[2,9], index: 5, kind: output, shape index: {}]  }
   0x1   :  { %v22_v0 = vld [vmem:[%s419_s2] sm:$0xff]  ;;  %v23_v1 = vld [vmem:[%s419_s2 + $0x8] sm:$0xff]  ;;  %v24_v2 = vld [vmem:[%s419_s2 + $0x10] sm:$0xff]  ;;  %271 = vmatprep.subr.bf16.mxu1 %v318_v3  ;;  %267 = vmatprep.subr.bf16.mxu0 %v318_v3  ;;  %vm321_vm2 = vmmov 1  }
   0x2   :  { %v272_v4 = vpack.c.bf16 %v23_v1, %v22_v0  ;;  %v25_v5 = vld [vmem:[%s419_s2 + $0x18] sm:$0xff]  ;;  %237 = vmatprep.mubr.msk.f32.mxu0 %vm319_vm1, %v320_v6  ;;  %264 = vmatprep.mubr.msk.f32.mxu1 %vm319_vm1, %v320_v6  ;;  %v35_v8 = vld [vmem:[%s420_s3] sm:$0xff]  ;;  %v36_v9 = vld [vmem:[%s420_s3 + $0x8] sm:$0x3] }
   0x3   :  { %v275_v7 = vpack.c.bf16 %v25_v5, %v24_v2  ;;  %v26_v10 = vld [vmem:[%s419_s2 + $0x20] sm:$0xff]  ;;  %v27_v11 = vld [vmem:[%s419_s2 + $0x28] sm:$0xff]  ;;  %v268_v12 = vpack.c.bf16 %v36_v9, %v35_v8  ;;  %vm269_vm3 = vmpackc.low %vm41_vm0, %vm321_vm2 }
   0x4   :  { %273 = vmatpush3.bf16.msra.mxu1 %v272_v4 }
   0x5   :  { %274 = vmatprep.subr.bf16.mxu1 %v318_v3 }
   0x6   :  { %10 = vsyncpa [#allocation3], 0  ;;  %270 = vmatpush3.bf16.msk.msra.mxu0 %vm269_vm3, %v268_v12  ;;  %v34_v13 = vld [vmem:[%s418_s1] sm:$0x3]  ;;  %vm37_vm4 = vcmask 80896   ;;  %v278_v14 = vpack.c.bf16 %v27_v11, %v26_v10  ;;  %v28_v15 = vld [vmem:[%s419_s2 + $0x30] sm:$0xff] }
   0x7   :  { %v29_v16 = vld [vmem:[%s419_s2 + $0x38] sm:$0xff]  ;;  %v30_v18 = vld [vmem:[%s419_s2 + $0x40] sm:$0xff]  ;;  %v31_v19 = vld [vmem:[%s419_s2 + $0x48] sm:$0xff]  ;;  %vm115_vm5 = vcmask 785408   ;;  %s322_s25 = smov [#allocation2]   ;;  %vm197_vm6 = vcmask 66560  }
   0x8   :  { %276 = vmatpush3.bf16.msra.mxu1 %v275_v7  ;;  %v281_v17 = vpack.c.bf16 %v29_v16, %v28_v15  ;;  %v284_v20 = vpack.c.bf16 %v31_v19, %v30_v18  ;;  %v32_v21 = vld [vmem:[%s419_s2 + $0x50] sm:$0xff]  ;;  %v33_v22 = vld [vmem:[%s419_s2 + $0x58] sm:$0xff]  ;;  %v21_v24 = vld [vmem:[%s417_s0] sm:$0x3]  ;;  %s205_s26 = sshll.u32 %s322_s25, 4  ;;  %s206_s26 = int_to_ptr.vmem [resolvable:$true] %s205_s26 }
   0x9   :  { %277 = vmatprep.subr.bf16.mxu1 %v318_v3  ;;  %238 = vmatmul.mubr.msk.f32.vlgmr.msra.gmra.mrb[0].mxu0 %vm37_vm4, %v34_v13  ;;  %v287_v23 = vpack.c.bf16 %v33_v22, %v32_v21  ;;  %v216_v28 = vld [vmem:[%s421_s4] ss:$0 sm:$0xff]  ;;  %s294_s2 = scalar_lea.vmem %s206_s26, 32  ;;  %p299_p1 = scmp.lt.s32.totalorder %s206_s26, %s206_s26 }
   0xa   :  { %p295_p0 = scmp.ne.s32.totalorder %s206_s26, %s294_s2  ;;  %p300_p2 = scmp.lt.s32.totalorder %s294_s2, %s294_s2 }
   0xc   :  { %279 = vmatpush3.bf16.msra.mxu1 %v278_v14  ;;  %p301_p3 = por %p300_p2, %p299_p1 }
   0xd   :  { %280 = vmatprep.subr.bf16.mxu1 %v318_v3 }
   0xe   :  { %p302_p4 = pnand %p301_p3, %p295_p0 }
  0x10   :  { %282 = vmatpush3.bf16.msra.mxu1 %v281_v17 }
  0x11   :  { %283 = vmatprep.subr.bf16.mxu1 %v318_v3 }
  0x14   :  { %285 = vmatpush3.bf16.msra.mxu1 %v284_v20 }
  0x15   :  { %286 = vmatprep.subr.bf16.mxu1 %v318_v3 }
  0x18   :  { %288 = vmatpush3.bf16.msra.mxu1 %v287_v23 }
  0x1b   :  { %265 = vmatmul.mubr.msk.f32.vlgmr.msra.gmra.mrb[0].mxu1 %vm115_vm5, %v21_v24 }
  0xdc   :  { %v111_v25 = vpop.f32.mrb[0].mxu0 }
  0xdd   :  { %v239_v26 = vpop.f32.mrb[1].mxu0 }
  0xee   :  { %v185_v27 = vpop.f32.mrb[0].mxu1 }
  0xef   :  { %v186_v29 = vadd.f32 %v185_v27, %v111_v25  ;;  %v266_v30 = vpop.f32.mrb[1].mxu1 }
  0xf1   :  { %v196_v31 = vadd.f32 %v216_v28, %v186_v29 }
  0xf3   :  { %198 = vst.msk [vmem:[#allocation2] sm:$0x3] %vm197_vm6, %v196_v31 }
  0xf4   :  { %305 = shalt.err (!%p302_p4)
}
  0xf5   :  { %s306_s28 = scalar_lea.hbm %s422_s5, 32 }
  0xf6   :  { %p307_p5 = scmp.ne.s32.totalorder %s422_s5, %s306_s28  ;;  %p310_p6 = scmp.lt.u32.totalorder %s306_s28, %s422_s5 }
  0xf8   :  { %p312_p7 = pnand %p310_p6, %p307_p5 }
  0xfa   :  { %315 = shalt.err (!%p312_p7)
}
  0xfb   :  { %208 = dma.vmem_to_hbm [thread:$0]  %s206_s26, 32, %s422_s5, [#allocation3]  }
  0xfc   :  { %316 = dma.done.wait [#allocation3], 32  }
  0xfd   :  { %317 = vsyncadd [#allocation3], 4294967264 }
  0xfe   :  { %212 = vsyncpa [#allocation3], 1 }

</bundles_post_ra>
